<compile_context>
chip_gen: v7x
topology: tpu7x:2x2x1
jax: 0.10.0
libtpu: 0.0.40
codegen_flags: <defaults>
</compile_context>

<pallas_src>
import jax
import jax.numpy as jnp
from jax.experimental import pallas as pl
from jax.experimental.pallas import tpu as pltpu


def _round_up(x, m):
    return (x + m - 1) // m * m


def lstm_cell_kernel(xh_ref, cx_ref, w_ref, b_ref, hy_ref, cy_ref):
    Hp = hy_ref.shape[-1]

    # One fused MXU matmul over [x | hx] with f32 accumulation, one bias add.
    gates = jnp.dot(xh_ref[...], w_ref[...],
                    preferred_element_type=jnp.float32) + b_ref[...]

    # Hp is a multiple of 128 -> every gate slice is a full-lane window.
    i_g = jax.nn.sigmoid(gates[:, 0 * Hp:1 * Hp])
    f_g = jax.nn.sigmoid(gates[:, 1 * Hp:2 * Hp])
    g_g = jnp.tanh(gates[:, 2 * Hp:3 * Hp])
    o_g = jax.nn.sigmoid(gates[:, 3 * Hp:4 * Hp])

    cx = cx_ref[...].astype(jnp.float32)
    cy = f_g * cx + i_g * g_g
    hy = o_g * jnp.tanh(cy)

    cy_ref[...] = cy.astype(cy_ref.dtype)     # lane-dense stores (Hp % 128 == 0)
    hy_ref[...] = hy.astype(hy_ref.dtype)


def prepare_lstm_params(weight_ih, weight_hh, bias, *, compute_dtype=None):
    """One-time parameter prep: transpose, fuse [W_ih^T ; W_hh^T], lane-pad gates.

    weight_ih: [4H, In], weight_hh: [4H, H], bias: [4H].
    Returns a dict consumed by lstm_cell(); call this once, not per timestep.
    """
    four_h, in_size = weight_ih.shape
    H = four_h // 4
    Hp = _round_up(H, 128)            # lane-align each gate
    K = in_size + H
    Kp = _round_up(K, 8)              # sublane-align the contraction dim
    if compute_dtype is None:
        compute_dtype = weight_ih.dtype   # pass jnp.bfloat16 here for bf16 MXU path

    # Fused transposed weights: gates = [x | hx] @ w
    w = jnp.concatenate([weight_ih.T, weight_hh.T], axis=0)          # [K, 4H]
    w = w.reshape(K, 4, H)
    w = jnp.pad(w, ((0, Kp - K), (0, 0), (0, Hp - H)))               # [Kp, 4, Hp]
    w = w.reshape(Kp, 4 * Hp).astype(compute_dtype)

    b = bias.reshape(4, H).astype(jnp.float32)
    b = jnp.pad(b, ((0, 0), (0, Hp - H))).reshape(1, 4 * Hp)         # [1, 4*Hp]

    return {"w": w, "b": b, "in_size": in_size, "H": H, "Hp": Hp, "K": K, "Kp": Kp}


def lstm_cell(x, hx, cx, params, *, batch_tile=128):
    """x: [B, In], hx/cx: [B, H], params: from prepare_lstm_params. Returns (hy, cy)."""
    B = x.shape[0]
    H, Hp, K, Kp = params["H"], params["Hp"], params["K"], params["Kp"]
    w, b = params["w"], params["b"]
    out_dtype = x.dtype

    if cx is None:
        cx = jnp.zeros((B, H), dtype=jnp.float32)

    # Per-step data prep: fuse activations and pad to tile-friendly shapes.
    xh = jnp.concatenate([x, hx], axis=-1).astype(w.dtype)           # [B, K]

    TB = min(batch_tile, _round_up(B, 8))
    Bp = _round_up(B, TB)
    xh = jnp.pad(xh, ((0, Bp - B), (0, Kp - K)))                     # [Bp, Kp]
    cxp = jnp.pad(cx.astype(jnp.float32), ((0, Bp - B), (0, Hp - H)))  # [Bp, Hp]

    grid = (Bp // TB,)

    # VMEM budget: resident weights + bias + double-buffered streamed tiles + headroom.
    itb = jnp.dtype(w.dtype).itemsize
    vmem_bytes = (
        w.size * itb + b.size * 4
        + 2 * (TB * Kp * itb + TB * Hp * 4)                  # xh/cx tiles, x2 buffers
        + 2 * 2 * TB * Hp * jnp.dtype(out_dtype).itemsize    # hy/cy tiles, x2 buffers
        + 6 * TB * 4 * Hp * 4                                # gate intermediates headroom
    )
    vmem_limit = int(min(max(vmem_bytes, 32 * 1024 * 1024), 64 * 1024 * 1024))

    hy, cy = pl.pallas_call(
        lstm_cell_kernel,
        out_shape=(jax.ShapeDtypeStruct((Bp, Hp), out_dtype),
                   jax.ShapeDtypeStruct((Bp, Hp), out_dtype)),
        grid=grid,
        in_specs=[
            pl.BlockSpec((TB, Kp), lambda i: (i, 0)),         # streamed [x|hx] tile
            pl.BlockSpec((TB, Hp), lambda i: (i, 0)),         # streamed cx tile
            pl.BlockSpec((Kp, 4 * Hp), lambda i: (0, 0)),     # weights: VMEM-resident
            pl.BlockSpec((1, 4 * Hp), lambda i: (0, 0)),      # bias: VMEM-resident
        ],
        out_specs=(pl.BlockSpec((TB, Hp), lambda i: (i, 0)),
                   pl.BlockSpec((TB, Hp), lambda i: (i, 0))),
        compiler_params=pltpu.CompilerParams(
            dimension_semantics=("parallel",),
            vmem_limit_bytes=vmem_limit),
    )(xh, cxp, w, b)

    return hy[:B, :H], cy[:B, :H]


def lstm_cell_ref(x, hx, cx, weight_ih, weight_hh, bias):
    gates = x @ weight_ih.T + hx @ weight_hh.T + bias
    i, f, g, o = jnp.split(gates, 4, axis=-1)
    i, f, g, o = jax.nn.sigmoid(i), jax.nn.sigmoid(f), jnp.tanh(g), jax.nn.sigmoid(o)
    cy = f * cx + i * g
    hy = o * jnp.tanh(cy)
    return hy, cy


if __name__ == "__main__":
    B, In, H = 8, 32, 32
    key = jax.random.PRNGKey(0)
    kx, kh, kc, kwi, kwh = jax.random.split(key, 5)

    x = jax.random.normal(kx, (B, In), dtype=jnp.float32)
    hx = jax.random.normal(kh, (B, H), dtype=jnp.float32)
    cx = jax.random.normal(kc, (B, H), dtype=jnp.float32)

    # Deterministic kaiming-uniform-like init: U(-bound, bound), bound = sqrt(6 / fan_in)
    bound_ih = (6.0 / In) ** 0.5
    bound_hh = (6.0 / H) ** 0.5
    weight_ih = jax.random.uniform(kwi, (4 * H, In), minval=-bound_ih, maxval=bound_ih,
                                   dtype=jnp.float32)
    weight_hh = jax.random.uniform(kwh, (4 * H, H), minval=-bound_hh, maxval=bound_hh,
                                   dtype=jnp.float32)
    bias = jnp.zeros((4 * H,), dtype=jnp.float32)

    # One-time parameter prep (transpose + fuse + lane-pad), reused across calls/steps.
    params = prepare_lstm_params(weight_ih, weight_hh, bias)

    hy, cy = lstm_cell(x, hx, cx, params)
    jax.block_until_ready((hy, cy))

    hy_ref, cy_ref = lstm_cell_ref(x, hx, cx, weight_ih, weight_hh, bias)
    assert hy.shape == (B, H) and cy.shape == (B, H)
    assert jnp.allclose(hy, hy_ref, atol=1e-5, rtol=1e-5)
    assert jnp.allclose(cy, cy_ref, atol=1e-5, rtol=1e-5)

    print("KERNEL_OK")
</pallas_src>

<mosaic_0001>
module attributes {stable_mosaic.version = 11 : i64} {
  func.func @lstm_cell_kernel(%arg0: i32, %arg1: memref<8x64xf32, #tpu.memory_space<vmem>>, %arg2: memref<8x128xf32, #tpu.memory_space<vmem>>, %arg3: memref<64x512xf32, #tpu.memory_space<vmem>>, %arg4: memref<1x512xf32, #tpu.memory_space<vmem>>, %arg5: memref<8x128xf32, #tpu.memory_space<vmem>>, %arg6: memref<8x128xf32, #tpu.memory_space<vmem>>) attributes {dimension_semantics = [#tpu.dimension_semantics<parallel>], iteration_bounds = array<i64: 1>, scalar_prefetch = 0 : i64, scratch_operands = 0 : i64, tpu.core_type = #tpu.core_type<tc>, window_params = [{transform_indices = @transform_0, window_bounds = array<i64: 8, 64>}, {transform_indices = @transform_1, window_bounds = array<i64: 8, 128>}, {pipeline_mode = #tpu.pipeline_mode<synchronous>, transform_indices = @transform_2, window_bounds = array<i64: 64, 512>}, {pipeline_mode = #tpu.pipeline_mode<synchronous>, transform_indices = @transform_3, window_bounds = array<i64: 1, 512>}, {transform_indices = @transform_4, window_bounds = array<i64: 8, 128>}, {transform_indices = @transform_5, window_bounds = array<i64: 8, 128>}]} {
    %c0 = arith.constant 0 : index
    %c0_0 = arith.constant 0 : index
    %0 = vector.load %arg1[%c0, %c0_0] : memref<8x64xf32, #tpu.memory_space<vmem>>, vector<8x64xf32>
    %c0_1 = arith.constant 0 : index
    %c0_2 = arith.constant 0 : index
    %1 = vector.load %arg3[%c0_1, %c0_2] : memref<64x512xf32, #tpu.memory_space<vmem>>, vector<64x512xf32>
    %cst = arith.constant dense<0.000000e+00> : vector<8x512xf32>
    %2 = tpu.matmul %0, %1, %cst {dimension_numbers = #tpu.dot_dimension_numbers<[1], [0], [0], [1], [0, 0, 1, 1], [], []>} : vector<8x64xf32>, vector<64x512xf32>, vector<8x512xf32> -> vector<8x512xf32>
    %c0_3 = arith.constant 0 : index
    %c0_4 = arith.constant 0 : index
    %3 = vector.load %arg4[%c0_3, %c0_4] : memref<1x512xf32, #tpu.memory_space<vmem>>, vector<1x512xf32>
    %4 = vector.broadcast %3 : vector<1x512xf32> to vector<8x512xf32>
    %5 = arith.addf %2, %4 : vector<8x512xf32>
    %6 = vector.extract_strided_slice %5 {offsets = [0, 0], sizes = [8, 128], strides = [1, 1]} : vector<8x512xf32> to vector<8x128xf32>
    %7 = arith.negf %6 : vector<8x128xf32>
    %8 = math.exp %7 : vector<8x128xf32>
    %cst_5 = arith.constant 1.000000e+00 : f32
    %9 = vector.broadcast %cst_5 : f32 to vector<8x128xf32>
    %10 = arith.addf %9, %8 : vector<8x128xf32>
    %11 = arith.divf %9, %10 : vector<8x128xf32>
    %12 = vector.extract_strided_slice %5 {offsets = [0, 128], sizes = [8, 128], strides = [1, 1]} : vector<8x512xf32> to vector<8x128xf32>
    %13 = arith.negf %12 : vector<8x128xf32>
    %14 = math.exp %13 : vector<8x128xf32>
    %cst_6 = arith.constant 1.000000e+00 : f32
    %15 = vector.broadcast %cst_6 : f32 to vector<8x128xf32>
    %16 = arith.addf %15, %14 : vector<8x128xf32>
    %17 = arith.divf %15, %16 : vector<8x128xf32>
    %18 = vector.extract_strided_slice %5 {offsets = [0, 256], sizes = [8, 128], strides = [1, 1]} : vector<8x512xf32> to vector<8x128xf32>
    %19 = math.tanh %18 : vector<8x128xf32>
    %20 = vector.extract_strided_slice %5 {offsets = [0, 384], sizes = [8, 128], strides = [1, 1]} : vector<8x512xf32> to vector<8x128xf32>
    %21 = arith.negf %20 : vector<8x128xf32>
    %22 = math.exp %21 : vector<8x128xf32>
    %cst_7 = arith.constant 1.000000e+00 : f32
    %23 = vector.broadcast %cst_7 : f32 to vector<8x128xf32>
    %24 = arith.addf %23, %22 : vector<8x128xf32>
    %25 = arith.divf %23, %24 : vector<8x128xf32>
    %c0_8 = arith.constant 0 : index
    %c0_9 = arith.constant 0 : index
    %26 = vector.load %arg2[%c0_8, %c0_9] : memref<8x128xf32, #tpu.memory_space<vmem>>, vector<8x128xf32>
    %27 = arith.mulf %17, %26 : vector<8x128xf32>
    %28 = arith.mulf %11, %19 : vector<8x128xf32>
    %29 = arith.addf %27, %28 : vector<8x128xf32>
    %30 = math.tanh %29 : vector<8x128xf32>
    %31 = arith.mulf %25, %30 : vector<8x128xf32>
    %c0_10 = arith.constant 0 : index
    %c0_11 = arith.constant 0 : index
    %32 = vector.load %arg6[%c0_10, %c0_11] : memref<8x128xf32, #tpu.memory_space<vmem>>, vector<8x128xf32>
    tpu.vector_store %arg6[%c0_10, %c0_11], %29 {strides = array<i32>} : memref<8x128xf32, #tpu.memory_space<vmem>>, vector<8x128xf32>,
    %c0_12 = arith.constant 0 : index
    %c0_13 = arith.constant 0 : index
    %33 = vector.load %arg5[%c0_12, %c0_13] : memref<8x128xf32, #tpu.memory_space<vmem>>, vector<8x128xf32>
    tpu.vector_store %arg5[%c0_12, %c0_13], %31 {strides = array<i32>} : memref<8x128xf32, #tpu.memory_space<vmem>>, vector<8x128xf32>,
    return
  }
  func.func @transform_0(%arg0: i32) -> (i32, i32) {
    %c0_i32 = arith.constant 0 : i32
    %c0_i32_0 = arith.constant 0 : i32
    return %arg0, %c0_i32 : i32, i32
  }
  func.func @transform_1(%arg0: i32) -> (i32, i32) {
    %c0_i32 = arith.constant 0 : i32
    %c0_i32_0 = arith.constant 0 : i32
    return %arg0, %c0_i32 : i32, i32
  }
  func.func @transform_2(%arg0: i32) -> (i32, i32) {
    %c0_i32 = arith.constant 0 : i32
    %c0_i32_0 = arith.constant 0 : i32
    %c0_i32_1 = arith.constant 0 : i32
    return %c0_i32, %c0_i32_0 : i32, i32
  }
  func.func @transform_3(%arg0: i32) -> (i32, i32) {
    %c0_i32 = arith.constant 0 : i32
    %c0_i32_0 = arith.constant 0 : i32
    %c0_i32_1 = arith.constant 0 : i32
    return %c0_i32, %c0_i32_0 : i32, i32
  }
  func.func @transform_4(%arg0: i32) -> (i32, i32) {
    %c0_i32 = arith.constant 0 : i32
    %c0_i32_0 = arith.constant 0 : i32
    return %arg0, %c0_i32 : i32, i32
  }
  func.func @transform_5(%arg0: i32) -> (i32, i32) {
    %c0_i32 = arith.constant 0 : i32
    %c0_i32_0 = arith.constant 0 : i32
    return %arg0, %c0_i32 : i32, i32
  }
}

</mosaic_0001>

<bundles_post_ra>
// kernel: tpu_custom_call.1
= control target key start
LH: loop header
LB: loop body
LE: loop exit
PB: predicated region body
PF: predicated region fallthrough
CT: control target
= control target key end

     0   :  { %11 = vsyncpa [#allocation3], 0  ;;  %s596_s0 = inlined_call_operand.hbm [shape: f32[8,64], index: 0, kind: input, shape index: {}]   ;;  %s597_s1 = inlined_call_operand.hbm [shape: f32[8,128], index: 1, kind: input, shape index: {}]   ;;  %s598_s2 = inlined_call_operand.hbm [shape: f32[64,512], index: 2, kind: input, shape index: {}]   ;;  %s599_s3 = inlined_call_operand.vmem [shape: f32[1,512], index: 3, kind: input, shape index: {}]   ;;  %s600_s4 = inlined_call_operand.hbm [shape: f32[8,128], index: 4, kind: output, shape index: {0}]   ;;  %s601_s5 = inlined_call_operand.hbm [shape: f32[8,128], index: 5, kind: output, shape index: {1}]  }
   0x1   :  { %12 = vsyncpa [#allocation6], 0 }
   0x2   :  { %13 = vsyncpa [#allocation4], 0 }
   0x3   :  { %14 = vsyncpa [#allocation10], 0  ;;  %s495_s18 = smov [#allocation5]   ;;  %s496_s20 = smov [#allocation2]  }
   0x4   :  { %s31_s19 = sshll.u32 %s495_s18, 4  ;;  %s21_s21 = sshll.u32 %s496_s20, 4  ;;  %s32_s19 = int_to_ptr.vmem [resolvable:$true] %s31_s19  ;;  %s22_s21 = int_to_ptr.vmem [resolvable:$true] %s21_s21 }
   0x5   :  { %s377_s24 = scalar_lea.hbm %s597_s1, 128 }
   0x6   :  { %p378_p0 = scmp.ne.s32.totalorder %s597_s1, %s377_s24  ;;  %p381_p1 = scmp.lt.u32.totalorder %s377_s24, %s597_s1 }
   0x8   :  { %p383_p2 = pnand %p381_p1, %p378_p0 }
   0xa   :  { %386 = shalt.err (!%p383_p2)
}
   0xb   :  { %s387_s29 = scalar_lea.vmem %s32_s19, 128  ;;  %p392_p4 = scmp.lt.s32.totalorder %s32_s19, %s32_s19 }
   0xc   :  { %p388_p3 = scmp.ne.s32.totalorder %s32_s19, %s387_s29  ;;  %p393_p5 = scmp.lt.s32.totalorder %s387_s29, %s387_s29 }
   0xe   :  { %p394_p6 = por %p393_p5, %p392_p4 }
  0x10   :  { %p395_p7 = pnand %p394_p6, %p388_p3 }
  0x12   :  { %398 = shalt.err (!%p395_p7)
}
  0x13   :  { %34 = dma.hbm_to_vmem [thread:$0]  %s597_s1, 128, %s32_s19, [#allocation6]  }
  0x14   :  { %s399_s9 = scalar_lea.hbm %s596_s0, 128 }
  0x15   :  { %p400_p8 = scmp.ne.s32.totalorder %s596_s0, %s399_s9  ;;  %p403_p9 = scmp.lt.u32.totalorder %s399_s9, %s596_s0 }
  0x17   :  { %p405_p10 = pnand %p403_p9, %p400_p8 }
  0x19   :  { %408 = shalt.err (!%p405_p10)
}
  0x1a   :  { %s409_s14 = scalar_lea.vmem %s22_s21, 128  ;;  %p414_p12 = scmp.lt.s32.totalorder %s22_s21, %s22_s21 }
  0x1b   :  { %p410_p11 = scmp.ne.s32.totalorder %s22_s21, %s409_s14  ;;  %p415_p13 = scmp.lt.s32.totalorder %s409_s14, %s409_s14 }
  0x1d   :  { %p416_p0 = por %p415_p13, %p414_p12 }
  0x1f   :  { %p417_p1 = pnand %p416_p0, %p410_p11 }
  0x21   :  { %420 = shalt.err (!%p417_p1)
}
  0x22   :  { %24 = dma.hbm_to_vmem [thread:$0]  %s596_s0, 128, %s22_s21, [#allocation3]  }
  0x23   :  { %s497_s16 = smov [#allocation7]   ;;  %s421_s20 = scalar_lea.hbm %s598_s2, 4096 }
  0x24   :  { %s40_s17 = sshll.u32 %s497_s16, 4  ;;  %p422_p2 = scmp.ne.s32.totalorder %s598_s2, %s421_s20  ;;  %s41_s17 = int_to_ptr.vmem [resolvable:$true] %s40_s17 }
  0x25   :  { %p425_p3 = scmp.lt.u32.totalorder %s421_s20, %s598_s2 }
  0x27   :  { %p427_p4 = pnand %p425_p3, %p422_p2 }
  0x29   :  { %430 = shalt.err (!%p427_p4)
}
  0x2a   :  { %s431_s26 = scalar_lea.vmem %s41_s17, 4096  ;;  %p436_p6 = scmp.lt.s32.totalorder %s41_s17, %s41_s17 }
  0x2b   :  { %p432_p5 = scmp.ne.s32.totalorder %s41_s17, %s431_s26  ;;  %p437_p7 = scmp.lt.s32.totalorder %s431_s26, %s431_s26 }
  0x2d   :  { %p438_p8 = por %p437_p7, %p436_p6 }
  0x2f   :  { %p439_p9 = pnand %p438_p8, %p432_p5 }
  0x31   :  { %442 = shalt.err (!%p439_p9)
}
  0x32   :  { %s498_s0 = smov 512   ;;  %s499_s21 = smov 32  }
  0x33   :  { %46 = dma.hbm_to_vmem [thread:$0]  %s598_s2, 4096, %s41_s17, [#allocation6], %s498_s0, %s498_s0, %s499_s21  }
  0x34   :  { %487 = dma.done.wait [#allocation3], 128  }
  0x35   :  { %488 = vsyncadd [#allocation3], 4294967168 }
  0x36   :  { %489 = dma.done.wait [#allocation6], 4224  }
  0x37   :  { %490 = vsyncadd [#allocation6], 4294963072  ;;  %v500_v0 = vmov 0.0   ;;  %v60_v1 = vld [vmem:[#allocation7 + $0x8] sm:$0xff]  ;;  %v59_v3 = vld [vmem:[#allocation7] sm:$0xff]  ;;  %vm113_vm0 = vcmask 523264   ;;  %v93_v50 = vlaneseq }
  0x38   :  { %181 = vmatprep.mubr.f32.mxu0 %v500_v0  ;;  %252 = vmatprep.mubr.f32.mxu1 %v500_v0  ;;  %v64_v2 = vld [vmem:[#allocation7 + $0x28] sm:$0xff]  ;;  %v63_v5 = vld [vmem:[#allocation7 + $0x20] sm:$0xff]  ;;  %v62_v19 = vld [vmem:[#allocation7 + $0x18] sm:$0xff] }
  0x39   :  { %v321_v4 = vpack.c.bf16 %v64_v2, %v60_v1  ;;  %v68_v6 = vld [vmem:[#allocation7 + $0x48] sm:$0xff]  ;;  %v323_v8 = vpack.c.bf16 %v63_v5, %v59_v3  ;;  %v67_v10 = vld [vmem:[#allocation7 + $0x40] sm:$0xff]  ;;  %v66_v20 = vld [vmem:[#allocation7 + $0x38] sm:$0xff]  ;;  %v94_v51 = vshrl.u32 %v93_v50, 7 }
  0x3a   :  { %v72_v7 = vld [vmem:[#allocation7 + $0x68] sm:$0xff]  ;;  %v71_v11 = vld [vmem:[#allocation7 + $0x60] sm:$0xff]  ;;  %v337_v22 = vpack.c.bf16 %v66_v20, %v62_v19  ;;  %v61_v23 = vld [vmem:[#allocation7 + $0x10] sm:$0xff] }
  0x3b   :  { %v325_v9 = vpack.c.bf16 %v72_v7, %v68_v6  ;;  %v76_v12 = vld [vmem:[#allocation7 + $0x88] sm:$0xff]  ;;  %322 = vmatprep.subr.bf16.mxu0 %v321_v4  ;;  %v327_v14 = vpack.c.bf16 %v71_v11, %v67_v10  ;;  %v75_v15 = vld [vmem:[#allocation7 + $0x80] sm:$0xff]  ;;  %v65_v24 = vld [vmem:[#allocation7 + $0x30] sm:$0xff]  ;;  %v95_v52 = vsub.s32 0, %v94_v51  ;;  %v99_v54 = vsub.s32 1, %v94_v51 }
  0x3c   :  { %v80_v13 = vld [vmem:[#allocation7 + $0xa8] sm:$0xff]  ;;  %324 = vmatpush1.bf16.msra.mxu0 %v323_v8  ;;  %v79_v16 = vld [vmem:[#allocation7 + $0xa0] sm:$0xff]  ;;  %v339_v25 = vpack.c.bf16 %v65_v24, %v61_v23  ;;  %v70_v26 = vld [vmem:[#allocation7 + $0x58] sm:$0xff]  ;;  %338 = vmatprep.subr.bf16.mxu1 %v337_v22  ;;  %v107_v57 = vsub.s32 3, %v94_v51  ;;  %v103_v1 = vsub.s32 2, %v94_v51 }
  0x3d   :  { %326 = vmatprep.subr.bf16.mxu0 %v325_v9  ;;  %v329_v17 = vpack.c.bf16 %v80_v13, %v76_v12  ;;  %v84_v18 = vld [vmem:[#allocation7 + $0xc8] sm:$0xff]  ;;  %v74_v27 = vld [vmem:[#allocation7 + $0x78] sm:$0xff]  ;;  %v69_v28 = vld [vmem:[#allocation7 + $0x50] sm:$0xff]  ;;  %v331_v29 = vpack.c.bf16 %v79_v16, %v75_v15 }
  0x3e   :  { %v88_v21 = vld [vmem:[#allocation7 + $0xe8] sm:$0xff]  ;;  %v341_v30 = vpack.c.bf16 %v74_v27, %v70_v26  ;;  %v73_v31 = vld [vmem:[#allocation7 + $0x70] sm:$0xff]  ;;  %v78_v32 = vld [vmem:[#allocation7 + $0x98] sm:$0xff]  ;;  %340 = vmatpush1.bf16.msra.mxu1 %v339_v25 }
  0x3f   :  { %v82_v33 = vld [vmem:[#allocation7 + $0xb8] sm:$0xff]  ;;  %v333_v34 = vpack.c.bf16 %v88_v21, %v84_v18  ;;  %v83_v35 = vld [vmem:[#allocation7 + $0xc0] sm:$0xff]  ;;  %v343_v37 = vpack.c.bf16 %v73_v31, %v69_v28  ;;  %v77_v39 = vld [vmem:[#allocation7 + $0x90] sm:$0xff] }
  0x40   :  { %328 = vmatpush1.bf16.msra.mxu0 %v327_v14  ;;  %v87_v36 = vld [vmem:[#allocation7 + $0xe0] sm:$0xff]  ;;  %342 = vmatprep.subr.bf16.mxu1 %v341_v30  ;;  %v345_v38 = vpack.c.bf16 %v82_v33, %v78_v32  ;;  %v81_v40 = vld [vmem:[#allocation7 + $0xb0] sm:$0xff]  ;;  %v86_v41 = vld [vmem:[#allocation7 + $0xd8] sm:$0xff] }
  0x41   :  { %330 = vmatprep.subr.bf16.mxu0 %v329_v17  ;;  %v90_v42 = vld [vmem:[#allocation7 + $0xf8] sm:$0xff]  ;;  %v335_v43 = vpack.c.bf16 %v87_v36, %v83_v35  ;;  %v347_v44 = vpack.c.bf16 %v81_v40, %v77_v39  ;;  %v85_v46 = vld [vmem:[#allocation7 + $0xd0] sm:$0xff] }
  0x42   :  { %344 = vmatpush1.bf16.msra.mxu1 %v343_v37  ;;  %v349_v45 = vpack.c.bf16 %v90_v42, %v86_v41  ;;  %v89_v47 = vld [vmem:[#allocation7 + $0xf0] sm:$0xff]  ;;  %v278_v14 = vld [vmem:[#allocation5] sm:$0xff] }
  0x43   :  { %346 = vmatprep.subr.bf16.mxu1 %v345_v38  ;;  %v58_v48 = vld [vmem:[#allocation2] sm:$0xff]  ;;  %v351_v49 = vpack.c.bf16 %v89_v47, %v85_v46 }
  0x44   :  { %332 = vmatpush1.bf16.msra.mxu0 %v331_v29  ;;  %v91_v53 = vld [vmem:[%s599_s3] sm:$0xf]  ;;  %s501_s3 = smov [#allocation9]  }
  0x45   :  { %334 = vmatprep.subr.bf16.mxu0 %v333_v34  ;;  %v96_v55 = vrot.slane %v91_v53, %v95_v52  ;;  %v100_v56 = vrot.slane %v91_v53, %v99_v54  ;;  %v108_v63 = vrot.slane %v91_v53, %v107_v57  ;;  %v104_v5 = vrot.slane %v91_v53, %v103_v1  ;;  %s302_s30 = sshll.u32 %s501_s3, 4  ;;  %s303_s30 = int_to_ptr.vmem [resolvable:$true] %s302_s30 }
  0x46   :  { %348 = vmatpush1.bf16.msra.mxu1 %v347_v44  ;;  %s443_s6 = scalar_lea.vmem %s303_s30, 128  ;;  %p448_p11 = scmp.lt.s32.totalorder %s303_s30, %s303_s30 }
  0x47   :  { %350 = vmatprep.subr.bf16.mxu1 %v349_v45  ;;  %p444_p10 = scmp.ne.s32.totalorder %s303_s30, %s443_s6  ;;  %p449_p12 = scmp.lt.s32.totalorder %s443_s6, %s443_s6 }
  0x48   :  { %336 = vmatpush1.bf16.msra.mxu0 %v335_v43 }
  0x49   :  { %p450_p13 = por %p449_p12, %p448_p11 }
  0x4a   :  { %352 = vmatpush1.bf16.msra.mxu1 %v351_v49 }
  0x4b   :  { %316 = vmatmul.mubr.msk.f32.vlgmr.msra.gmra.mrb[0].mxu0 %vm113_vm0, %v58_v48  ;;  %p451_p0 = pnand %p450_p13, %p444_p10 }
  0x4d   :  { %317 = vmatmul.mubr.msk.f32.vlgmr.msra.gmra.mrb[0].mxu1 %vm113_vm0, %v58_v48 }
 0x11e   :  { %v183_v58 = vpop.f32.mrb[0].mxu0 }
 0x11f   :  { %v184_v59 = vadd.f32 %v183_v58, %v96_v55  ;;  %v185_v60 = vpop.f32.mrb[1].mxu0 }
 0x120   :  { %v186_v61 = vadd.f32 %v185_v60, %v100_v56  ;;  %v254_v2 = vpop.f32.mrb[0].mxu1 }
 0x121   :  { %v318_v62 = vmul.f32 -1.442695, %v184_v59  ;;  %v256_v3 = vpop.f32.mrb[1].mxu1  ;;  %v255_v7 = vadd.f32 %v254_v2, %v104_v5 }
 0x122   :  { %v319_v0 = vmul.f32 -1.442695, %v186_v61  ;;  %v257_v4 = vadd.f32 %v256_v3, %v108_v63 }
 0x123   :  { %361 = vpow2.f32 %v318_v62 }
 0x124   :  { %363 = vpow2.f32 %v319_v0  ;;  %v320_v6 = vmul.f32 -1.442695, %v257_v4 }
 0x126   :  { %365 = vpow2.f32 %v320_v6 }
 0x127   :  { %367 = vtanh.f32 %v255_v7 }
 0x12d   :  { %v362_v8 = vpop.eup %361 }
 0x12e   :  { %v364_v9 = vpop.eup %363  ;;  %v262_v10 = vadd.f32 1.0, %v362_v8 }
 0x12f   :  { %v268_v11 = vadd.f32 1.0, %v364_v9 }
 0x130   :  { %369 = vrcp.f32 %v262_v10  ;;  %v366_v12 = vpop.eup %365 }
 0x131   :  { %371 = vrcp.f32 %v268_v11  ;;  %v368_v13 = vpop.eup %367  ;;  %v275_v16 = vadd.f32 1.0, %v366_v12 }
 0x133   :  { %373 = vrcp.f32 %v275_v16 }
 0x13a   :  { %v370_v15 = vpop.eup %369 }
 0x13b   :  { %v372_v17 = vpop.eup %371  ;;  %v280_v18 = vmul.f32 %v370_v15, %v368_v13 }
 0x13c   :  { %v279_v19 = vmul.f32 %v372_v17, %v278_v14 }
 0x13e   :  { %v281_v20 = vadd.f32 %v280_v18, %v279_v19 }
 0x140   :  { %284 = vst [vmem:[#allocation9] sm:$0xff] %v281_v20  ;;  %375 = vtanh.f32 %v281_v20 }
 0x141   :  { %454 = shalt.err (!%p451_p0)
}
 0x142   :  { %s455_s9 = scalar_lea.hbm %s601_s5, 128 }
 0x143   :  { %p456_p1 = scmp.ne.s32.totalorder %s601_s5, %s455_s9  ;;  %p459_p2 = scmp.lt.u32.totalorder %s455_s9, %s601_s5 }
 0x145   :  { %p461_p3 = pnand %p459_p2, %p456_p1 }
 0x147   :  { %464 = shalt.err (!%p461_p3)
}
 0x148   :  { %305 = dma.vmem_to_hbm [thread:$0]  %s303_s30, 128, %s601_s5, [#allocation10]   ;;  %v374_v21 = vpop.eup %373 }
 0x149   :  { %s502_s15 = smov [#allocation8]  }
 0x14a   :  { %s292_s16 = sshll.u32 %s502_s15, 4  ;;  %v376_v22 = vpop.eup %375  ;;  %s293_s16 = int_to_ptr.vmem [resolvable:$true] %s292_s16 }
 0x14b   :  { %v283_v23 = vmul.f32 %v376_v22, %v374_v21  ;;  %s465_s17 = scalar_lea.vmem %s293_s16, 128  ;;  %p470_p5 = scmp.lt.s32.totalorder %s293_s16, %s293_s16 }
 0x14c   :  { %p466_p4 = scmp.ne.s32.totalorder %s293_s16, %s465_s17  ;;  %p471_p6 = scmp.lt.s32.totalorder %s465_s17, %s465_s17 }
 0x14d   :  { %285 = vst [vmem:[#allocation8] sm:$0xff] %v283_v23 }
 0x14e   :  { %p472_p7 = por %p471_p6, %p470_p5 }
 0x150   :  { %p473_p8 = pnand %p472_p7, %p466_p4 }
 0x152   :  { %476 = shalt.err (!%p473_p8)
}
 0x153   :  { %s477_s20 = scalar_lea.hbm %s600_s4, 128 }
 0x154   :  { %p478_p9 = scmp.ne.s32.totalorder %s600_s4, %s477_s20  ;;  %p481_p10 = scmp.lt.u32.totalorder %s477_s20, %s600_s4 }
 0x156   :  { %p483_p11 = pnand %p481_p10, %p478_p9 }
 0x158   :  { %486 = shalt.err (!%p483_p11)
}
 0x159   :  { %295 = dma.vmem_to_hbm [thread:$0]  %s293_s16, 128, %s600_s4, [#allocation4]  }
 0x15a   :  { %491 = dma.done.wait [#allocation4], 128  }
 0x15b   :  { %492 = vsyncadd [#allocation4], 4294967168 }
 0x15c   :  { %493 = dma.done.wait [#allocation10], 128  }
 0x15d   :  { %494 = vsyncadd [#allocation10], 4294967168 }
 0x15e   :  { %312 = vsyncpa [#allocation3], 1 }
 0x15f   :  { %313 = vsyncpa [#allocation6], 1 }
 0x160   :  { %314 = vsyncpa [#allocation4], 1 }
 0x161   :  { %315 = vsyncpa [#allocation10], 1 }

</bundles_post_ra>
